<compile_context>
chip_gen: v7x
topology: tpu7x:2x2x1
jax: 0.10.0
libtpu: 0.0.40
codegen_flags: <defaults>
</compile_context>

<pallas_src>
import jax
import jax.numpy as jnp
import numpy as np
from jax.experimental import pallas as pl
from jax.experimental.pallas import tpu as pltpu

L = 512   # feature dim (fixed by the module)
D = 128   # attention hidden dim (fixed by the module)
K = 1     # heads per branch (fixed by the module); the two branches are fused -> 2


def gated_attention_kernel(x_ref, wvu_ref, bvu_ref, w12_ref,
                           m1_ref, m2_ref, a1_ref, a2_ref):
    """One grid step processes TB bags.

    x_ref   : (TB, N, L)
    wvu_ref : (L, 2D)  -- attention_V || attention_U weights fused column-wise
    bvu_ref : (1, 2D)
    w12_ref : (D, 2)   -- the two attention heads fused
    m1/m2   : (TB, 1, L) pooled bag features (per head)
    a1/a2   : (TB, 1, N) softmax attention weights (per head), lane-dense over N
    """
    tb, n, l = x_ref.shape
    x = x_ref[...]                                   # (TB, N, L)
    x2d = x.reshape(tb * n, l)                       # (TB*N, L): fills MXU M dim

    # Fused gated-attention trunk: ONE (TB*N, L) @ (L, 2D) matmul feeds both
    # branches; 2D = 256 output columns fills the 256-wide v6e/v7x MXU.
    pre = jnp.dot(x2d, wvu_ref[...], preferred_element_type=jnp.float32)
    pre = pre + bvu_ref[...]
    a_v = jnp.tanh(pre[:, :D])
    # sigmoid(z) == 0.5*(1 + tanh(z/2)): a single EUP op instead of exp+recip.
    a_u = 0.5 * (1.0 + jnp.tanh(0.5 * pre[:, D:]))
    gated = a_v * a_u                                # (TB*N, D)

    # Both attention heads in one small matmul.  (The pre-softmax bias is a
    # per-head constant and cancels in softmax, so it is dropped.)
    logits = jnp.dot(gated, w12_ref[...],
                     preferred_element_type=jnp.float32)          # (TB*N, 2)
    # Tiny transpose -> head-major, lane-dense-over-N layout for the softmax.
    logits = jnp.transpose(logits.reshape(tb, n, 2), (0, 2, 1))   # (TB, 2, N)

    # Per-bag, per-head softmax over the N instances (lane-axis reductions).
    mx = jnp.max(logits, axis=-1, keepdims=True)
    e = jnp.exp(logits - mx)
    s = jnp.sum(e, axis=-1, keepdims=True)
    # approx=True would move the divide fully to the EUP but loosens tolerance.
    att = e * pl.reciprocal(s, approx=False)         # (TB, 2, N)

    a1 = att[:, 0, :]                                # (TB, N)
    a2 = att[:, 1, :]
    a1_ref[:, 0, :] = a1
    a2_ref[:, 0, :] = a2

    # Attention pooling on the VPU/XLU: broadcast-multiply over the L lanes and
    # reduce over the N sublanes.  This replaces the per-bag (2,N)@(N,L)
    # batched dot_general, which issued 2*TB nearly-empty (M=2) MXU passes per
    # step; here the MXU stays free for the trunk.
    m1_ref[:, 0, :] = jnp.sum(a1[:, :, None] * x, axis=1)   # (TB, L)
    m2_ref[:, 0, :] = jnp.sum(a2[:, :, None] * x, axis=1)   # (TB, L)


def _vmem_capacity_bytes():
    """Generation-aware VMEM size (v5e/v6e: 128 MiB, v7x: 64 MiB per core)."""
    try:
        cap = int(pltpu.get_tpu_info().vmem_capacity_bytes)
        if cap > 0:
            return cap
    except Exception:
        pass
    return 64 << 20          # conservative fallback, safe on every generation


def _vmem_needed_bytes(tb, n):
    """Rough per-step footprint: double-buffered blocks + kernel intermediates."""
    x_blk = tb * n * L * 4
    out_blk = tb * (2 * L + 2 * n) * 4
    w_blk = (L * 2 * D + 2 * D + D * 2) * 4
    # pre-activations (2D) + tanh/sigmoid/gated (3D) + pooling temporaries.
    interm = tb * n * (5 * D) * 4 + 2 * x_blk + tb * 2 * L * 4
    return 2 * (x_blk + out_blk + w_blk) + interm + (4 << 20)


def _pick_bag_tile(B, N, vmem_budget_bytes):
    """Bags per grid step: ~2K MXU rows, bounded by VMEM; keep the grid >= 2."""
    rows_target = 2048                    # amortize ~0.35us per-grid-step overhead
    tb = max(1, min(B, rows_target // max(N, 1)))
    if B >= 2:
        # Grid length >= 2: feeds both v7x TensorCores (megacore) and gives the
        # pipeline a second step to overlap DMA with.  No-op on v5e/v6e.
        tb = min(tb, -(-B // 2))          # ceil(B / 2)
    while tb > 1 and _vmem_needed_bytes(tb, N) > vmem_budget_bytes:
        tb = max(1, tb // 2)
    return tb


@jax.jit
def gated_attention_pallas(x, wv, bv, wu, bu, w1, b1, w2, b2):
    B, N, Lx = x.shape
    assert Lx == L
    del b1, b2  # constant per-head shift before softmax: no-op for all outputs.

    # Fuse the two trunk linears column-wise and the two heads column-wise so
    # the kernel issues one 256-column trunk matmul and one 2-column head matmul.
    wvu = jnp.concatenate([wv, wu], axis=1)          # (L, 2D)
    bvu = jnp.concatenate([bv, bu], axis=1)          # (1, 2D)
    w12 = jnp.concatenate([w1, w2], axis=1)          # (D, 2)

    cap = _vmem_capacity_bytes()
    usable = int(cap * 0.85)              # leave headroom for compiler temporaries
    TB = _pick_bag_tile(B, N, usable)
    grid = (pl.cdiv(B, TB),)              # ragged last block: OOB rows dropped on store

    vmem_limit = int(min(usable, max(32 << 20, _vmem_needed_bytes(TB, N))))

    m1, m2, a1, a2 = pl.pallas_call(
        gated_attention_kernel,
        out_shape=(
            jax.ShapeDtypeStruct((B, 1, L), jnp.float32),   # M1
            jax.ShapeDtypeStruct((B, 1, L), jnp.float32),   # M2
            jax.ShapeDtypeStruct((B, 1, N), jnp.float32),   # A1
            jax.ShapeDtypeStruct((B, 1, N), jnp.float32),   # A2
        ),
        grid=grid,
        in_specs=[
            pl.BlockSpec((TB, N, L), lambda b: (b, 0, 0)),  # x: TB bags per step
            pl.BlockSpec((L, 2 * D), lambda b: (0, 0)),     # fused V/U weights
            pl.BlockSpec((1, 2 * D), lambda b: (0, 0)),     # fused V/U biases
            pl.BlockSpec((D, 2), lambda b: (0, 0)),         # fused head weights
        ],
        out_specs=(
            pl.BlockSpec((TB, 1, L), lambda b: (b, 0, 0)),
            pl.BlockSpec((TB, 1, L), lambda b: (b, 0, 0)),
            pl.BlockSpec((TB, 1, N), lambda b: (b, 0, 0)),
            pl.BlockSpec((TB, 1, N), lambda b: (b, 0, 0)),
        ),
        compiler_params=pltpu.CompilerParams(
            dimension_semantics=("parallel",),
            vmem_limit_bytes=vmem_limit),
    )(x, wvu, bvu, w12)

    # Drop the dummy axis (outputs were kept 3-D so the bag-tile dim stays a
    # leading, unconstrained block dim and the last two dims are full-extent).
    return m1[:, 0, :], m2[:, 0, :], a1[:, 0, :], a2[:, 0, :]


def init_params(key):
    """Deterministic init mirroring nn.Linear's U(-1/sqrt(fan_in), 1/sqrt(fan_in)).

    Weights are stored as (in, out), i.e. already transposed vs torch."""
    ks = jax.random.split(key, 8)
    def lin(kw, kb, fan_in, fan_out):
        bound = 1.0 / np.sqrt(fan_in)
        w = jax.random.uniform(kw, (fan_in, fan_out), jnp.float32, -bound, bound)
        b = jax.random.uniform(kb, (1, fan_out), jnp.float32, -bound, bound)
        return w, b
    wv, bv = lin(ks[0], ks[1], L, D)
    wu, bu = lin(ks[2], ks[3], L, D)
    w1, b1 = lin(ks[4], ks[5], D, K)
    w2, b2 = lin(ks[6], ks[7], D, K)
    return wv, bv, wu, bu, w1, b1, w2, b2


def gated_attention_reference(x, wv, bv, wu, bu, w1, b1, w2, b2):
    """Pure-JAX reference replicating the PyTorch forward exactly (biases incl.)."""
    a_v = jnp.tanh(x @ wv + bv)
    a_u = jax.nn.sigmoid(x @ wu + bu)
    gated = a_v * a_u
    a1 = jax.nn.softmax((gated @ w1 + b1)[..., 0], axis=-1)
    a2 = jax.nn.softmax((gated @ w2 + b2)[..., 0], axis=-1)
    m1 = jnp.einsum('bnl,bn->bl', x, a1)
    m2 = jnp.einsum('bnl,bn->bl', x, a2)
    return m1, m2, a1, a2


if __name__ == "__main__":
    key = jax.random.PRNGKey(0)
    k_x1, k_x2, k_p = jax.random.split(key, 3)
    params = init_params(k_p)

    # Case 1: small batch / bag size; L=512, D=128 fixed by the module.
    x1 = jax.random.normal(k_x1, (2, 8, L), dtype=jnp.float32)
    outs1 = jax.block_until_ready(gated_attention_pallas(x1, *params))
    refs1 = gated_attention_reference(x1, *params)
    for got, want in zip(outs1, refs1):
        np.testing.assert_allclose(np.asarray(got), np.asarray(want),
                                   rtol=1e-4, atol=1e-5)

    # Case 2: batch that does not divide the bag tile (exercises the ragged
    # last grid block: padded rows are computed on garbage and dropped on store).
    x2 = jax.random.normal(k_x2, (5, 8, L), dtype=jnp.float32)
    outs2 = jax.block_until_ready(gated_attention_pallas(x2, *params))
    refs2 = gated_attention_reference(x2, *params)
    for got, want in zip(outs2, refs2):
        np.testing.assert_allclose(np.asarray(got), np.asarray(want),
                                   rtol=1e-4, atol=1e-5)

    print("KERNEL_OK")
</pallas_src>

<mosaic_0001>
module attributes {stable_mosaic.version = 11 : i64} {
  func.func @gated_attention_kernel(%arg0: i32, %arg1: memref<1x8x512xf32, #tpu.memory_space<vmem>>, %arg2: memref<512x256xf32, #tpu.memory_space<vmem>>, %arg3: memref<1x256xf32, #tpu.memory_space<vmem>>, %arg4: memref<128x2xf32, #tpu.memory_space<vmem>>, %arg5: memref<1x1x512xf32, #tpu.memory_space<vmem>>, %arg6: memref<1x1x512xf32, #tpu.memory_space<vmem>>, %arg7: memref<1x1x8xf32, #tpu.memory_space<vmem>>, %arg8: memref<1x1x8xf32, #tpu.memory_space<vmem>>) attributes {dimension_semantics = [#tpu.dimension_semantics<parallel>], iteration_bounds = array<i64: 2>, scalar_prefetch = 0 : i64, scratch_operands = 0 : i64, tpu.core_type = #tpu.core_type<tc>, window_params = [{transform_indices = @transform_0, window_bounds = array<i64: 1, 8, 512>}, {pipeline_mode = #tpu.pipeline_mode<synchronous>, transform_indices = @transform_1, window_bounds = array<i64: 512, 256>}, {pipeline_mode = #tpu.pipeline_mode<synchronous>, transform_indices = @transform_2, window_bounds = array<i64: 1, 256>}, {pipeline_mode = #tpu.pipeline_mode<synchronous>, transform_indices = @transform_3, window_bounds = array<i64: 128, 2>}, {transform_indices = @transform_4, window_bounds = array<i64: 1, 1, 512>}, {transform_indices = @transform_5, window_bounds = array<i64: 1, 1, 512>}, {transform_indices = @transform_6, window_bounds = array<i64: 1, 1, 8>}, {transform_indices = @transform_7, window_bounds = array<i64: 1, 1, 8>}]} {
    %c0 = arith.constant 0 : index
    %c0_0 = arith.constant 0 : index
    %c0_1 = arith.constant 0 : index
    %0 = vector.load %arg1[%c0, %c0_0, %c0_1] : memref<1x8x512xf32, #tpu.memory_space<vmem>>, vector<1x8x512xf32>
    %1 = vector.shape_cast %0 : vector<1x8x512xf32> to vector<8x512xf32>
    %c0_2 = arith.constant 0 : index
    %c0_3 = arith.constant 0 : index
    %2 = vector.load %arg2[%c0_2, %c0_3] : memref<512x256xf32, #tpu.memory_space<vmem>>, vector<512x256xf32>
    %cst = arith.constant dense<0.000000e+00> : vector<8x256xf32>
    %3 = tpu.matmul %1, %2, %cst {dimension_numbers = #tpu.dot_dimension_numbers<[1], [0], [0], [1], [0, 0, 1, 1], [], []>} : vector<8x512xf32>, vector<512x256xf32>, vector<8x256xf32> -> vector<8x256xf32>
    %c0_4 = arith.constant 0 : index
    %c0_5 = arith.constant 0 : index
    %4 = vector.load %arg3[%c0_4, %c0_5] : memref<1x256xf32, #tpu.memory_space<vmem>>, vector<1x256xf32>
    %5 = vector.broadcast %4 : vector<1x256xf32> to vector<8x256xf32>
    %6 = arith.addf %3, %5 : vector<8x256xf32>
    %7 = vector.extract_strided_slice %6 {offsets = [0, 0], sizes = [8, 128], strides = [1, 1]} : vector<8x256xf32> to vector<8x128xf32>
    %8 = math.tanh %7 : vector<8x128xf32>
    %9 = vector.extract_strided_slice %6 {offsets = [0, 128], sizes = [8, 128], strides = [1, 1]} : vector<8x256xf32> to vector<8x128xf32>
    %cst_6 = arith.constant 5.000000e-01 : f32
    %10 = vector.broadcast %cst_6 : f32 to vector<8x128xf32>
    %11 = arith.mulf %10, %9 : vector<8x128xf32>
    %12 = math.tanh %11 : vector<8x128xf32>
    %cst_7 = arith.constant 1.000000e+00 : f32
    %13 = vector.broadcast %cst_7 : f32 to vector<8x128xf32>
    %14 = arith.addf %13, %12 : vector<8x128xf32>
    %cst_8 = arith.constant 5.000000e-01 : f32
    %15 = vector.broadcast %cst_8 : f32 to vector<8x128xf32>
    %16 = arith.mulf %15, %14 : vector<8x128xf32>
    %17 = arith.mulf %8, %16 : vector<8x128xf32>
    %c0_9 = arith.constant 0 : index
    %c0_10 = arith.constant 0 : index
    %18 = vector.load %arg4[%c0_9, %c0_10] : memref<128x2xf32, #tpu.memory_space<vmem>>, vector<128x2xf32>
    %cst_11 = arith.constant dense<0.000000e+00> : vector<8x2xf32>
    %19 = tpu.matmul %17, %18, %cst_11 {dimension_numbers = #tpu.dot_dimension_numbers<[1], [0], [0], [1], [0, 0, 1, 1], [], []>} : vector<8x128xf32>, vector<128x2xf32>, vector<8x2xf32> -> vector<8x2xf32>
    %20 = vector.shape_cast %19 : vector<8x2xf32> to vector<1x8x2xf32>
    %21 = tpu.transpose %20, [0, 2, 1] : vector<1x8x2xf32> -> vector<1x2x8xf32>
    %cst_12 = arith.constant dense<0xFF800000> : vector<1x2xf32>
    %22 = vector.multi_reduction <maximumf>, %21, %cst_12 [2] : vector<1x2x8xf32> to vector<1x2xf32>
    %23 = vector.shape_cast %22 : vector<1x2xf32> to vector<1x2x1xf32>
    %24 = vector.broadcast %23 : vector<1x2x1xf32> to vector<1x2x8xf32>
    %25 = arith.subf %21, %24 : vector<1x2x8xf32>
    %26 = math.exp %25 : vector<1x2x8xf32>
    %cst_13 = arith.constant dense<0.000000e+00> : vector<1x2xf32>
    %27 = vector.multi_reduction <add>, %26, %cst_13 [2] : vector<1x2x8xf32> to vector<1x2xf32>
    %28 = vector.shape_cast %27 : vector<1x2xf32> to vector<1x2x1xf32>
    %29 = tpu.reciprocal %28 : vector<1x2x1xf32> -> vector<1x2x1xf32>
    %30 = vector.broadcast %29 : vector<1x2x1xf32> to vector<1x2x8xf32>
    %31 = arith.mulf %26, %30 : vector<1x2x8xf32>
    %32 = vector.extract_strided_slice %31 {offsets = [0, 0, 0], sizes = [1, 1, 8], strides = [1, 1, 1]} : vector<1x2x8xf32> to vector<1x1x8xf32>
    %33 = vector.shape_cast %32 : vector<1x1x8xf32> to vector<1x8xf32>
    %34 = vector.extract_strided_slice %31 {offsets = [0, 1, 0], sizes = [1, 1, 8], strides = [1, 1, 1]} : vector<1x2x8xf32> to vector<1x1x8xf32>
    %35 = vector.shape_cast %34 : vector<1x1x8xf32> to vector<1x8xf32>
    %c0_14 = arith.constant 0 : index
    %c0_15 = arith.constant 0 : index
    %c0_16 = arith.constant 0 : index
    %36 = vector.load %arg7[%c0_14, %c0_15, %c0_16] : memref<1x1x8xf32, #tpu.memory_space<vmem>>, vector<1x1x8xf32>
    %37 = vector.shape_cast %36 : vector<1x1x8xf32> to vector<1x8xf32>
    %38 = vector.shape_cast %33 : vector<1x8xf32> to vector<1x1x8xf32>
    tpu.vector_store %arg7[%c0_14, %c0_15, %c0_16], %38 {strides = array<i32>} : memref<1x1x8xf32, #tpu.memory_space<vmem>>, vector<1x1x8xf32>,
    %c0_17 = arith.constant 0 : index
    %c0_18 = arith.constant 0 : index
    %c0_19 = arith.constant 0 : index
    %39 = vector.load %arg8[%c0_17, %c0_18, %c0_19] : memref<1x1x8xf32, #tpu.memory_space<vmem>>, vector<1x1x8xf32>
    %40 = vector.shape_cast %39 : vector<1x1x8xf32> to vector<1x8xf32>
    %41 = vector.shape_cast %35 : vector<1x8xf32> to vector<1x1x8xf32>
    tpu.vector_store %arg8[%c0_17, %c0_18, %c0_19], %41 {strides = array<i32>} : memref<1x1x8xf32, #tpu.memory_space<vmem>>, vector<1x1x8xf32>,
    %42 = vector.shape_cast %33 : vector<1x8xf32> to vector<1x8x1xf32>
    %43 = vector.broadcast %42 : vector<1x8x1xf32> to vector<1x8x512xf32>
    %44 = arith.mulf %43, %0 : vector<1x8x512xf32>
    %cst_20 = arith.constant dense<0.000000e+00> : vector<1x512xf32>
    %45 = vector.multi_reduction <add>, %44, %cst_20 [1] : vector<1x8x512xf32> to vector<1x512xf32>
    %c0_21 = arith.constant 0 : index
    %c0_22 = arith.constant 0 : index
    %c0_23 = arith.constant 0 : index
    %46 = vector.load %arg5[%c0_21, %c0_22, %c0_23] : memref<1x1x512xf32, #tpu.memory_space<vmem>>, vector<1x1x512xf32>
    %47 = vector.shape_cast %46 : vector<1x1x512xf32> to vector<1x512xf32>
    %48 = vector.shape_cast %45 : vector<1x512xf32> to vector<1x1x512xf32>
    tpu.vector_store %arg5[%c0_21, %c0_22, %c0_23], %48 {strides = array<i32>} : memref<1x1x512xf32, #tpu.memory_space<vmem>>, vector<1x1x512xf32>,
    %49 = vector.shape_cast %35 : vector<1x8xf32> to vector<1x8x1xf32>
    %50 = vector.broadcast %49 : vector<1x8x1xf32> to vector<1x8x512xf32>
    %51 = arith.mulf %50, %0 : vector<1x8x512xf32>
    %cst_24 = arith.constant dense<0.000000e+00> : vector<1x512xf32>
    %52 = vector.multi_reduction <add>, %51, %cst_24 [1] : vector<1x8x512xf32> to vector<1x512xf32>
    %c0_25 = arith.constant 0 : index
    %c0_26 = arith.constant 0 : index
    %c0_27 = arith.constant 0 : index
    %53 = vector.load %arg6[%c0_25, %c0_26, %c0_27] : memref<1x1x512xf32, #tpu.memory_space<vmem>>, vector<1x1x512xf32>
    %54 = vector.shape_cast %53 : vector<1x1x512xf32> to vector<1x512xf32>
    %55 = vector.shape_cast %52 : vector<1x512xf32> to vector<1x1x512xf32>
    tpu.vector_store %arg6[%c0_25, %c0_26, %c0_27], %55 {strides = array<i32>} : memref<1x1x512xf32, #tpu.memory_space<vmem>>, vector<1x1x512xf32>,
    return
  }
  func.func @transform_0(%arg0: i32) -> (i32, i32, i32) {
    %c0_i32 = arith.constant 0 : i32
    %c0_i32_0 = arith.constant 0 : i32
    %c0_i32_1 = arith.constant 0 : i32
    return %arg0, %c0_i32, %c0_i32_0 : i32, i32, i32
  }
  func.func @transform_1(%arg0: i32) -> (i32, i32) {
    %c0_i32 = arith.constant 0 : i32
    %c0_i32_0 = arith.constant 0 : i32
    %c0_i32_1 = arith.constant 0 : i32
    return %c0_i32, %c0_i32_0 : i32, i32
  }
  func.func @transform_2(%arg0: i32) -> (i32, i32) {
    %c0_i32 = arith.constant 0 : i32
    %c0_i32_0 = arith.constant 0 : i32
    %c0_i32_1 = arith.constant 0 : i32
    return %c0_i32, %c0_i32_0 : i32, i32
  }
  func.func @transform_3(%arg0: i32) -> (i32, i32) {
    %c0_i32 = arith.constant 0 : i32
    %c0_i32_0 = arith.constant 0 : i32
    %c0_i32_1 = arith.constant 0 : i32
    return %c0_i32, %c0_i32_0 : i32, i32
  }
  func.func @transform_4(%arg0: i32) -> (i32, i32, i32) {
    %c0_i32 = arith.constant 0 : i32
    %c0_i32_0 = arith.constant 0 : i32
    %c0_i32_1 = arith.constant 0 : i32
    return %arg0, %c0_i32, %c0_i32_0 : i32, i32, i32
  }
  func.func @transform_5(%arg0: i32) -> (i32, i32, i32) {
    %c0_i32 = arith.constant 0 : i32
    %c0_i32_0 = arith.constant 0 : i32
    %c0_i32_1 = arith.constant 0 : i32
    return %arg0, %c0_i32, %c0_i32_0 : i32, i32, i32
  }
  func.func @transform_6(%arg0: i32) -> (i32, i32, i32) {
    %c0_i32 = arith.constant 0 : i32
    %c0_i32_0 = arith.constant 0 : i32
    %c0_i32_1 = arith.constant 0 : i32
    return %arg0, %c0_i32, %c0_i32_0 : i32, i32, i32
  }
  func.func @transform_7(%arg0: i32) -> (i32, i32, i32) {
    %c0_i32 = arith.constant 0 : i32
    %c0_i32_0 = arith.constant 0 : i32
    %c0_i32_1 = arith.constant 0 : i32
    return %arg0, %c0_i32, %c0_i32_0 : i32, i32, i32
  }
}

</mosaic_0001>

<bundles_post_ra>
// kernel: gated_attention_pallas.1
= control target key start
LH: loop header
LB: loop body
LE: loop exit
PB: predicated region body
PF: predicated region fallthrough
CT: control target
= control target key end

     0   :  { %s2078_s0 = inlined_call_operand.vmem [shape: f32[2,8,512], index: 0, kind: input, shape index: {}]   ;;  %s2079_s1 = inlined_call_operand.vmem [shape: f32[512,256], index: 1, kind: input, shape index: {}]   ;;  %s2080_s2 = inlined_call_operand.vmem [shape: f32[1,256], index: 2, kind: input, shape index: {}]   ;;  %s2081_s3 = inlined_call_operand.vmem [shape: f32[128,2], index: 3, kind: input, shape index: {}]   ;;  %s2082_s4 = inlined_call_operand.vmem [shape: f32[2,1,512], index: 4, kind: output, shape index: {0}]   ;;  %s2083_s5 = inlined_call_operand.vmem [shape: f32[2,1,512], index: 5, kind: output, shape index: {1}]   ;;  %s2084_s6 = inlined_call_operand.hbm [shape: f32[2,1,8], index: 6, kind: output, shape index: {2}]   ;;  %s2085_s7 = inlined_call_operand.hbm [shape: f32[2,1,8], index: 7, kind: output, shape index: {3}]  }
   0x1   :  { %2087 = sst [smem:[#allocation8_spill]] %s2078_s0 }
   0x2   :  { %2088 = sst [smem:[#allocation9_spill]] %s2079_s1 }
   0x3   :  { %13 = vsyncpa [#allocation3], 0 }
   0x4   :  { %15 = vsyncpa [#allocation3 + $0x1], 0 }
   0x5   :  { %16 = vsyncpa [#allocation5], 0 }
   0x6   :  { %18 = vsyncpa [#allocation5 + $0x1], 0  ;;  %s1460_s24 = smov 0   ;;  %s1462_s25 = smov 0  }
   0x7   :  { %s1464_s26 = smov 0   ;;  %s1466_s27 = smov 0  }
   0x8 LB: > { %s1481_s28 = sadd.s32 4294967295, %s1412_s27   ;;  %s1041_s29 = sadd.s32 4294967294, %s1412_s27   ;;  %s1412_s27 = sphi %s1466_s27, %s2097_s27   ;;  %s1408_s26 = sphi %s1464_s26, %s2096_s26   ;;  %s1404_s25 = sphi %s1462_s25, %s2095_s25   ;;  %s1400_s24 = sphi %s1460_s24, %s2094_s24  }
   0x9   : > { %s1485_s30 = sadd.s32 1, %s1412_s27   ;;  %s172_s8 = sadd.s32 1, %s1408_s26 }
   0xa   : > { %s169_s9 = ssub.s32 %s1412_s27, %s1485_s30  ;;  %p182_p0 = scmp.ne.s32.totalorder %s1408_s26, %s1404_s25 }
   0xb   : > { %p170_p1 = scmp.eq.s32.totalorder %s169_s9, 0  ;;  %p183_p2 = scmp.eq.s32.totalorder %s1481_s28, 1 }
   0xc   : > { %p188_p3 = scmp.ne.s32.totalorder %s1404_s25, %s1400_s24  ;;  %p189_p4 = scmp.eq.s32.totalorder %s1041_s29, 1 }
   0xd   : > { %s1496_s10 = scalar_select %p170_p1, %s1408_s26, %s172_s8  }
   0xe   : > { %p1498_p5 = por %p183_p2, %p182_p0  ;;  %p1502_p6 = por %p189_p4, %p188_p3 }
   0xf   : > { %p1044_p7 = scmp.ge.s32.totalorder %s1412_s27, 1  ;;  %p250_p8 = scmp.lt.s32.totalorder %s1412_s27, 3 }
  0x11   : > { %p251_p9 = pnand %p1044_p7, %p250_p8 }
  0x12   : > { %s2091_s1 = sld [smem:[#allocation9_spill]] (!%p251_p9)  ;;  %p293_p10 = scmp.lt.s32.totalorder (!%p251_p9), %s1481_s28, 1  ;;  %vm1415_vm0 = vmmov (!%p251_p9), 0   ;;  %vm716_vm1 = vcmask (!%p251_p9), 58368   ;;  %vm728_vm2 = vcmask (!%p251_p9), 57344   ;;  %vm730_vm3 = vcmask (!%p251_p9), 58369  }
  0x13   : > { %254 = sbr.rel (%p251_p9) target bundleno = 1127 (0x467), region = 36  ;;  %s2092_s0 = sld [smem:[#allocation8_spill]] (!%p251_p9) }
  0x14   : > { %s1049_s20 = sshll.u32 (!%p251_p9), %s1481_s28, 4  ;;  %s1417_s16 = smov (!%p251_p9), [#allocation2]  }
  0x15   : > { %s1989_s9 = scalar_lea.hbm (!%p251_p9), %s2084_s6, %s1049_s20 }
  0x18   : > { %v311_v0 = vld [vmem:[%s2091_s1 + $0x8] sm:$0xff] (!%p251_p9)  ;;  %v313_v1 = vld [vmem:[%s2091_s1 + $0x18] sm:$0xff] (!%p251_p9)  ;;  %v310_v2 = vld [vmem:[%s2091_s1] sm:$0xff] (!%p251_p9) }
  0x19   : > { %v1106_v3 = vpack.c.bf16 (!%p251_p9), %v313_v1, %v311_v0  ;;  %v312_v4 = vld [vmem:[%s2091_s1 + $0x10] sm:$0xff] (!%p251_p9)  ;;  %v375_v5 = vld [vmem:[%s2091_s1 + $0x208] sm:$0xff] (!%p251_p9)  ;;  %v377_v6 = vld [vmem:[%s2091_s1 + $0x218] sm:$0xff] (!%p251_p9) }
  0x1a   : > { %v1108_v7 = vpack.c.bf16 %v312_v4, %v310_v2  ;;  %v1170_v8 = vpack.c.bf16 %v377_v6, %v375_v5  ;;  %v374_v9 = vld [vmem:[%s2091_s1 + $0x200] sm:$0xff]  ;;  %v376_v10 = vld [vmem:[%s2091_s1 + $0x210] sm:$0xff]  ;;  %v315_v11 = vld [vmem:[%s2091_s1 + $0x28] sm:$0xff]  ;;  %s1740_s8 = scalar_select %p293_p10, %s1481_s28, 1 }
  0x1b   : > { %1107 = vmatprep.subr.bf16.mxu1 %v1106_v3  ;;  %v1172_v12 = vpack.c.bf16 %v376_v10, %v374_v9  ;;  %v317_v13 = vld [vmem:[%s2091_s1 + $0x38] sm:$0xff]  ;;  %v314_v14 = vld [vmem:[%s2091_s1 + $0x20] sm:$0xff]  ;;  %v316_v15 = vld [vmem:[%s2091_s1 + $0x30] sm:$0xff] }
  0x1c   : > { %1109 = vmatpush1.bf16.msra.mxu1 %v1108_v7  ;;  %1171 = vmatprep.subr.bf16.mxu0 %v1170_v8  ;;  %v1110_v16 = vpack.c.bf16 %v317_v13, %v315_v11  ;;  %v1112_v17 = vpack.c.bf16 %v316_v15, %v314_v14  ;;  %v379_v18 = vld [vmem:[%s2091_s1 + $0x228] sm:$0xff]  ;;  %v381_v19 = vld [vmem:[%s2091_s1 + $0x238] sm:$0xff]  ;;  %v378_v20 = vld [vmem:[%s2091_s1 + $0x220] sm:$0xff]  ;;  %s1053_s15 = sshll.u32 %s1740_s8, 5 }
  0x1d   : > { %1173 = vmatpush1.bf16.msra.mxu0 %v1172_v12  ;;  %v1174_v21 = vpack.c.bf16 %v381_v19, %v379_v18  ;;  %v380_v22 = vld [vmem:[%s2091_s1 + $0x230] sm:$0xff]  ;;  %v319_v23 = vld [vmem:[%s2091_s1 + $0x48] sm:$0xff]  ;;  %v321_v24 = vld [vmem:[%s2091_s1 + $0x58] sm:$0xff]  ;;  %s1794_s22 = scalar_lea.vmem %s2092_s0, %s1053_s15  ;;  %s1322_s15 = sshll.u32 %s1417_s16, 4  ;;  %s1323_s15 = int_to_ptr.vmem [resolvable:$false] %s1322_s15 }
  0x1e   : > { %1111 = vmatprep.subr.bf16.mxu1 %v1110_v16  ;;  %v1176_v25 = vpack.c.bf16 %v380_v22, %v378_v20  ;;  %v1114_v26 = vpack.c.bf16 %v321_v24, %v319_v23  ;;  %v318_v27 = vld [vmem:[%s2091_s1 + $0x40] sm:$0xff]  ;;  %v320_v28 = vld [vmem:[%s2091_s1 + $0x50] sm:$0xff]  ;;  %v383_v29 = vld [vmem:[%s2091_s1 + $0x248] sm:$0xff]  ;;  %s1324_s17 = scalar_lea.vmem %s1323_s15, 32 }
  0x1f   : > { %1175 = vmatprep.subr.bf16.mxu0 %v1174_v21  ;;  %v385_v30 = vld [vmem:[%s2091_s1 + $0x258] sm:$0xff]  ;;  %v382_v31 = vld [vmem:[%s2091_s1 + $0x240] sm:$0xff]  ;;  %v384_v32 = vld [vmem:[%s2091_s1 + $0x250] sm:$0xff]  ;;  %v1116_v33 = vpack.c.bf16 %v320_v28, %v318_v27 }
  0x20   : > { %1113 = vmatpush1.bf16.msra.mxu1 %v1112_v17  ;;  %v1178_v34 = vpack.c.bf16 %v385_v30, %v383_v29  ;;  %v323_v35 = vld [vmem:[%s2091_s1 + $0x68] sm:$0xff]  ;;  %v325_v36 = vld [vmem:[%s2091_s1 + $0x78] sm:$0xff]  ;;  %v322_v37 = vld [vmem:[%s2091_s1 + $0x60] sm:$0xff]  ;;  %v1180_v38 = vpack.c.bf16 %v384_v32, %v382_v31 }
  0x21   : > { %1177 = vmatpush1.bf16.msra.mxu0 %v1176_v25  ;;  %1115 = vmatprep.subr.bf16.mxu1 %v1114_v26  ;;  %v1118_v39 = vpack.c.bf16 %v325_v36, %v323_v35  ;;  %v324_v40 = vld [vmem:[%s2091_s1 + $0x70] sm:$0xff]  ;;  %v387_v41 = vld [vmem:[%s2091_s1 + $0x268] sm:$0xff]  ;;  %v389_v42 = vld [vmem:[%s2091_s1 + $0x278] sm:$0xff] }
  0x22   : > { %1179 = vmatprep.subr.bf16.mxu0 %v1178_v34  ;;  %v1182_v43 = vpack.c.bf16 %v389_v42, %v387_v41  ;;  %v386_v44 = vld [vmem:[%s2091_s1 + $0x260] sm:$0xff]  ;;  %v388_v45 = vld [vmem:[%s2091_s1 + $0x270] sm:$0xff]  ;;  %v327_v46 = vld [vmem:[%s2091_s1 + $0x88] sm:$0xff]  ;;  %v1120_v48 = vpack.c.bf16 %v324_v40, %v322_v37 }
  0x23   : > { %v329_v47 = vld [vmem:[%s2091_s1 + $0x98] sm:$0xff]  ;;  %v391_v49 = vld [vmem:[%s2091_s1 + $0x288] sm:$0xff]  ;;  %v1184_v51 = vpack.c.bf16 %v388_v45, %v386_v44  ;;  %v326_v53 = vld [vmem:[%s2091_s1 + $0x80] sm:$0xff] }
  0x24   : > { %1117 = vmatpush1.bf16.msra.mxu1 %v1116_v33  ;;  %v393_v50 = vld [vmem:[%s2091_s1 + $0x298] sm:$0xff]  ;;  %v1122_v52 = vpack.c.bf16 %v329_v47, %v327_v46  ;;  %v328_v54 = vld [vmem:[%s2091_s1 + $0x90] sm:$0xff]  ;;  %v390_v55 = vld [vmem:[%s2091_s1 + $0x280] sm:$0xff] }
  0x25   : > { %1181 = vmatpush1.bf16.msra.mxu0 %v1180_v38  ;;  %1119 = vmatprep.subr.bf16.mxu1 %v1118_v39  ;;  %v1186_v56 = vpack.c.bf16 %v393_v50, %v391_v49  ;;  %v392_v57 = vld [vmem:[%s2091_s1 + $0x290] sm:$0xff]  ;;  %v331_v58 = vld [vmem:[%s2091_s1 + $0xa8] sm:$0xff]  ;;  %v333_v59 = vld [vmem:[%s2091_s1 + $0xb8] sm:$0xff]  ;;  %v1124_v62 = vpack.c.bf16 %v328_v54, %v326_v53 }
  0x26   : > { %1183 = vmatprep.subr.bf16.mxu0 %v1182_v43  ;;  %v395_v60 = vld [vmem:[%s2091_s1 + $0x2a8] sm:$0xff]  ;;  %v397_v61 = vld [vmem:[%s2091_s1 + $0x2b8] sm:$0xff]  ;;  %v1188_v63 = vpack.c.bf16 %v392_v57, %v390_v55  ;;  %v1126_v0 = vpack.c.bf16 %v333_v59, %v331_v58  ;;  %v330_v1 = vld [vmem:[%s2091_s1 + $0xa0] sm:$0xff] }
  0x27   : > { %v332_v2 = vld [vmem:[%s2091_s1 + $0xb0] sm:$0xff]  ;;  %v394_v3 = vld [vmem:[%s2091_s1 + $0x2a0] sm:$0xff]  ;;  %v1190_v4 = vpack.c.bf16 %v397_v61, %v395_v60  ;;  %v335_v6 = vld [vmem:[%s2091_s1 + $0xc8] sm:$0xff] }
  0x28   : > { %1121 = vmatpush1.bf16.msra.mxu1 %v1120_v48  ;;  %v396_v5 = vld [vmem:[%s2091_s1 + $0x2b0] sm:$0xff]  ;;  %v337_v7 = vld [vmem:[%s2091_s1 + $0xd8] sm:$0xff]  ;;  %v399_v8 = vld [vmem:[%s2091_s1 + $0x2c8] sm:$0xff]  ;;  %v1128_v10 = vpack.c.bf16 %v332_v2, %v330_v1 }
  0x29   : > { %1185 = vmatpush1.bf16.msra.mxu0 %v1184_v51  ;;  %1123 = vmatprep.subr.bf16.mxu1 %v1122_v52  ;;  %v401_v9 = vld [vmem:[%s2091_s1 + $0x2d8] sm:$0xff]  ;;  %v1192_v11 = vpack.c.bf16 %v396_v5, %v394_v3  ;;  %v1130_v12 = vpack.c.bf16 %v337_v7, %v335_v6  ;;  %v334_v13 = vld [vmem:[%s2091_s1 + $0xc0] sm:$0xff]  ;;  %v336_v14 = vld [vmem:[%s2091_s1 + $0xd0] sm:$0xff] }
  0x2a   : > { %1187 = vmatprep.subr.bf16.mxu0 %v1186_v56  ;;  %v398_v15 = vld [vmem:[%s2091_s1 + $0x2c0] sm:$0xff]  ;;  %v1194_v16 = vpack.c.bf16 %v401_v9, %v399_v8  ;;  %v400_v17 = vld [vmem:[%s2091_s1 + $0x2d0] sm:$0xff]  ;;  %v339_v18 = vld [vmem:[%s2091_s1 + $0xe8] sm:$0xff]  ;;  %v1132_v22 = vpack.c.bf16 %v336_v14, %v334_v13 }
  0x2b   : > { %v341_v19 = vld [vmem:[%s2091_s1 + $0xf8] sm:$0xff]  ;;  %v403_v20 = vld [vmem:[%s2091_s1 + $0x2e8] sm:$0xff]  ;;  %v1196_v23 = vpack.c.bf16 %v400_v17, %v398_v15  ;;  %v338_v25 = vld [vmem:[%s2091_s1 + $0xe0] sm:$0xff] }
  0x2c   : > { %1125 = vmatpush1.bf16.msra.mxu1 %v1124_v62  ;;  %v405_v21 = vld [vmem:[%s2091_s1 + $0x2f8] sm:$0xff]  ;;  %v1134_v24 = vpack.c.bf16 %v341_v19, %v339_v18  ;;  %v340_v26 = vld [vmem:[%s2091_s1 + $0xf0] sm:$0xff]  ;;  %v402_v27 = vld [vmem:[%s2091_s1 + $0x2e0] sm:$0xff] }
  0x2d   : > { %1189 = vmatpush1.bf16.msra.mxu0 %v1188_v63  ;;  %1127 = vmatprep.subr.bf16.mxu1 %v1126_v0  ;;  %v1198_v28 = vpack.c.bf16 %v405_v21, %v403_v20  ;;  %v404_v29 = vld [vmem:[%s2091_s1 + $0x2f0] sm:$0xff]  ;;  %v343_v30 = vld [vmem:[%s2091_s1 + $0x108] sm:$0xff]  ;;  %v345_v31 = vld [vmem:[%s2091_s1 + $0x118] sm:$0xff]  ;;  %v1136_v34 = vpack.c.bf16 %v340_v26, %v338_v25 }
  0x2e   : > { %1191 = vmatprep.subr.bf16.mxu0 %v1190_v4  ;;  %v407_v32 = vld [vmem:[%s2091_s1 + $0x308] sm:$0xff]  ;;  %v409_v33 = vld [vmem:[%s2091_s1 + $0x318] sm:$0xff]  ;;  %v1200_v35 = vpack.c.bf16 %v404_v29, %v402_v27  ;;  %v1138_v36 = vpack.c.bf16 %v345_v31, %v343_v30  ;;  %v342_v37 = vld [vmem:[%s2091_s1 + $0x100] sm:$0xff] }
  0x2f   : > { %v344_v38 = vld [vmem:[%s2091_s1 + $0x110] sm:$0xff]  ;;  %v406_v39 = vld [vmem:[%s2091_s1 + $0x300] sm:$0xff]  ;;  %v1202_v40 = vpack.c.bf16 %v409_v33, %v407_v32  ;;  %v347_v42 = vld [vmem:[%s2091_s1 + $0x128] sm:$0xff] }
  0x30   : > { %1129 = vmatpush1.bf16.msra.mxu1 %v1128_v10  ;;  %v408_v41 = vld [vmem:[%s2091_s1 + $0x310] sm:$0xff]  ;;  %v349_v43 = vld [vmem:[%s2091_s1 + $0x138] sm:$0xff]  ;;  %v411_v44 = vld [vmem:[%s2091_s1 + $0x328] sm:$0xff]  ;;  %v1140_v46 = vpack.c.bf16 %v344_v38, %v342_v37 }
  0x31   : > { %1193 = vmatpush1.bf16.msra.mxu0 %v1192_v11  ;;  %1131 = vmatprep.subr.bf16.mxu1 %v1130_v12  ;;  %v413_v45 = vld [vmem:[%s2091_s1 + $0x338] sm:$0xff]  ;;  %v1204_v47 = vpack.c.bf16 %v408_v41, %v406_v39  ;;  %v1142_v48 = vpack.c.bf16 %v349_v43, %v347_v42  ;;  %v346_v49 = vld [vmem:[%s2091_s1 + $0x120] sm:$0xff]  ;;  %v348_v50 = vld [vmem:[%s2091_s1 + $0x130] sm:$0xff] }
  0x32   : > { %1195 = vmatprep.subr.bf16.mxu0 %v1194_v16  ;;  %v410_v51 = vld [vmem:[%s2091_s1 + $0x320] sm:$0xff]  ;;  %v1206_v52 = vpack.c.bf16 %v413_v45, %v411_v44  ;;  %v412_v53 = vld [vmem:[%s2091_s1 + $0x330] sm:$0xff]  ;;  %v351_v54 = vld [vmem:[%s2091_s1 + $0x148] sm:$0xff]  ;;  %v1144_v58 = vpack.c.bf16 %v348_v50, %v346_v49 }
  0x33   : > { %v353_v55 = vld [vmem:[%s2091_s1 + $0x158] sm:$0xff]  ;;  %v415_v56 = vld [vmem:[%s2091_s1 + $0x348] sm:$0xff]  ;;  %v1208_v59 = vpack.c.bf16 %v412_v53, %v410_v51  ;;  %v350_v61 = vld [vmem:[%s2091_s1 + $0x140] sm:$0xff] }
  0x34   : > { %1133 = vmatpush1.bf16.msra.mxu1 %v1132_v22  ;;  %v417_v57 = vld [vmem:[%s2091_s1 + $0x358] sm:$0xff]  ;;  %v1146_v60 = vpack.c.bf16 %v353_v55, %v351_v54  ;;  %v352_v62 = vld [vmem:[%s2091_s1 + $0x150] sm:$0xff]  ;;  %v414_v63 = vld [vmem:[%s2091_s1 + $0x340] sm:$0xff] }
  0x35   : > { %1197 = vmatpush1.bf16.msra.mxu0 %v1196_v23  ;;  %1135 = vmatprep.subr.bf16.mxu1 %v1134_v24  ;;  %v1210_v0 = vpack.c.bf16 %v417_v57, %v415_v56  ;;  %v416_v1 = vld [vmem:[%s2091_s1 + $0x350] sm:$0xff]  ;;  %v355_v2 = vld [vmem:[%s2091_s1 + $0x168] sm:$0xff]  ;;  %v357_v3 = vld [vmem:[%s2091_s1 + $0x178] sm:$0xff]  ;;  %v1148_v6 = vpack.c.bf16 %v352_v62, %v350_v61 }
  0x36   : > { %1199 = vmatprep.subr.bf16.mxu0 %v1198_v28  ;;  %v419_v4 = vld [vmem:[%s2091_s1 + $0x368] sm:$0xff]  ;;  %v421_v5 = vld [vmem:[%s2091_s1 + $0x378] sm:$0xff]  ;;  %v354_v7 = vld [vmem:[%s2091_s1 + $0x160] sm:$0xff]  ;;  %v1212_v8 = vpack.c.bf16 %v416_v1, %v414_v63  ;;  %v1150_v9 = vpack.c.bf16 %v357_v3, %v355_v2 }
  0x37   : > { %v356_v10 = vld [vmem:[%s2091_s1 + $0x170] sm:$0xff]  ;;  %v418_v11 = vld [vmem:[%s2091_s1 + $0x360] sm:$0xff]  ;;  %v1214_v13 = vpack.c.bf16 %v421_v5, %v419_v4  ;;  %v359_v14 = vld [vmem:[%s2091_s1 + $0x188] sm:$0xff] }
  0x38   : > { %1137 = vmatpush1.bf16.msra.mxu1 %v1136_v34  ;;  %v420_v12 = vld [vmem:[%s2091_s1 + $0x370] sm:$0xff]  ;;  %v361_v15 = vld [vmem:[%s2091_s1 + $0x198] sm:$0xff]  ;;  %v1815_v16 = vld [vmem:[%s1794_s22 + $0x8] sm:$0xff]  ;;  %v1152_v20 = vpack.c.bf16 %v356_v10, %v354_v7  ;;  %v1414_v7 = vmov 0.0|0.0  }
  0x39   : > { %1201 = vmatpush1.bf16.msra.mxu0 %v1200_v35  ;;  %1139 = vmatprep.subr.bf16.mxu1 %v1138_v36  ;;  %v423_v17 = vld [vmem:[%s2091_s1 + $0x388] sm:$0xff]  ;;  %v425_v18 = vld [vmem:[%s2091_s1 + $0x398] sm:$0xff]  ;;  %v1216_v21 = vpack.c.bf16 %v420_v12, %v418_v11  ;;  %v1154_v22 = vpack.c.bf16 %v361_v15, %v359_v14  ;;  %v358_v23 = vld [vmem:[%s2091_s1 + $0x180] sm:$0xff] }
  0x3a   : > { %1203 = vmatprep.subr.bf16.mxu0 %v1202_v40  ;;  %514 = vmatprep.mubr.f32.mxu1 %v1815_v16  ;;  %v1825_v19 = vld [vmem:[%s1794_s22 + $0x18] sm:$0xff]  ;;  %v360_v24 = vld [vmem:[%s2091_s1 + $0x190] sm:$0xff]  ;;  %v422_v25 = vld [vmem:[%s2091_s1 + $0x380] sm:$0xff]  ;;  %v1218_v26 = vpack.c.bf16 %v425_v18, %v423_v17 }
  0x3b   : > { %585 = vmatprep.mubr.f32.mxu0 %v1825_v19  ;;  %v424_v27 = vld [vmem:[%s2091_s1 + $0x390] sm:$0xff]  ;;  %v363_v28 = vld [vmem:[%s2091_s1 + $0x1a8] sm:$0xff]  ;;  %v365_v29 = vld [vmem:[%s2091_s1 + $0x1b8] sm:$0xff]  ;;  %v1156_v32 = vpack.c.bf16 %v360_v24, %v358_v23 }
  0x3c   : > { %1141 = vmatpush1.bf16.msra.mxu1 %v1140_v46  ;;  %v427_v30 = vld [vmem:[%s2091_s1 + $0x3a8] sm:$0xff]  ;;  %v429_v31 = vld [vmem:[%s2091_s1 + $0x3b8] sm:$0xff]  ;;  %v1220_v33 = vpack.c.bf16 %v424_v27, %v422_v25  ;;  %v1158_v34 = vpack.c.bf16 %v365_v29, %v363_v28  ;;  %v362_v35 = vld [vmem:[%s2091_s1 + $0x1a0] sm:$0xff] }
  0x3d   : > { %1205 = vmatpush1.bf16.msra.mxu0 %v1204_v47  ;;  %1143 = vmatprep.subr.bf16.mxu1 %v1142_v48  ;;  %v364_v36 = vld [vmem:[%s2091_s1 + $0x1b0] sm:$0xff]  ;;  %v426_v37 = vld [vmem:[%s2091_s1 + $0x3a0] sm:$0xff]  ;;  %v1222_v38 = vpack.c.bf16 %v429_v31, %v427_v30  ;;  %v367_v40 = vld [vmem:[%s2091_s1 + $0x1c8] sm:$0xff]  ;;  %v1416_v31 = vmov 0.0  }
  0x3e   : > { %1207 = vmatprep.subr.bf16.mxu0 %v1206_v52  ;;  %v428_v39 = vld [vmem:[%s2091_s1 + $0x3b0] sm:$0xff]  ;;  %v369_v41 = vld [vmem:[%s2091_s1 + $0x1d8] sm:$0xff]  ;;  %v431_v42 = vld [vmem:[%s2091_s1 + $0x3c8] sm:$0xff]  ;;  %v1160_v44 = vpack.c.bf16 %v364_v36, %v362_v35 }
  0x3f   : > { %v433_v43 = vld [vmem:[%s2091_s1 + $0x3d8] sm:$0xff]  ;;  %v1224_v45 = vpack.c.bf16 %v428_v39, %v426_v37  ;;  %v1162_v46 = vpack.c.bf16 %v369_v41, %v367_v40  ;;  %v366_v47 = vld [vmem:[%s2091_s1 + $0x1c0] sm:$0xff]  ;;  %v368_v48 = vld [vmem:[%s2091_s1 + $0x1d0] sm:$0xff] }
  0x40   : > { %1145 = vmatpush1.bf16.msra.mxu1 %v1144_v58  ;;  %v430_v49 = vld [vmem:[%s2091_s1 + $0x3c0] sm:$0xff]  ;;  %v1226_v50 = vpack.c.bf16 %v433_v43, %v431_v42  ;;  %v432_v51 = vld [vmem:[%s2091_s1 + $0x3d0] sm:$0xff]  ;;  %v371_v52 = vld [vmem:[%s2091_s1 + $0x1e8] sm:$0xff]  ;;  %v1164_v56 = vpack.c.bf16 %v368_v48, %v366_v47 }
  0x41   : > { %1209 = vmatpush1.bf16.msra.mxu0 %v1208_v59  ;;  %1147 = vmatprep.subr.bf16.mxu1 %v1146_v60  ;;  %v373_v53 = vld [vmem:[%s2091_s1 + $0x1f8] sm:$0xff]  ;;  %v435_v54 = vld [vmem:[%s2091_s1 + $0x3e8] sm:$0xff]  ;;  %v1228_v57 = vpack.c.bf16 %v432_v51, %v430_v49  ;;  %v370_v59 = vld [vmem:[%s2091_s1 + $0x1e0] sm:$0xff] }
  0x42   : > { %1211 = vmatprep.subr.bf16.mxu0 %v1210_v0  ;;  %v437_v55 = vld [vmem:[%s2091_s1 + $0x3f8] sm:$0xff]  ;;  %v1166_v58 = vpack.c.bf16 %v373_v53, %v371_v52  ;;  %v372_v60 = vld [vmem:[%s2091_s1 + $0x1f0] sm:$0xff]  ;;  %v434_v62 = vld [vmem:[%s2091_s1 + $0x3e0] sm:$0xff] }
  0x43   : > { %v1230_v61 = vpack.c.bf16 %v437_v55, %v435_v54  ;;  %v436_v63 = vld [vmem:[%s2091_s1 + $0x3f0] sm:$0xff]  ;;  %v1168_v0 = vpack.c.bf16 %v372_v60, %v370_v59  ;;  %v598_v2 = vld [vmem:[%s2081_s3] sm:$0xff]  ;;  %v599_v3 = vld [vmem:[%s2081_s3 + $0x8] sm:$0xff] }
  0x44   : > { %1149 = vmatpush1.bf16.msra.mxu1 %v1148_v6  ;;  %v1232_v1 = vpack.c.bf16 %v436_v63, %v434_v62  ;;  %v1919_v4 = vld [vmem:[%s1794_s22] sm:$0xff]  ;;  %v1235_v5 = vpack.c.bf16 %v599_v3, %v598_v2  ;;  %v1922_v6 = vld [vmem:[%s1794_s22 + $0x10] sm:$0xff]  ;;  %v603_v12 = vld [vmem:[%s2081_s3 + $0x28] sm:$0xff]  ;;  %s1977_s22 = sand.u32 1, %s1404_s25  }
  0x45   : > { %1213 = vmatpush1.bf16.msra.mxu0 %v1212_v8  ;;  %1151 = vmatprep.subr.bf16.mxu1 %v1150_v9  ;;  %v600_v8 = vld [vmem:[%s2081_s3 + $0x10] sm:$0xff]  ;;  %v601_v9 = vld [vmem:[%s2081_s3 + $0x18] sm:$0xff]  ;;  %v602_v11 = vld [vmem:[%s2081_s3 + $0x20] sm:$0xff]  ;;  %s286_s18 = scalar_lea.vmem [#allocation2], %s1977_s22  ;;  %s2086_s19 = scalar_lea.vmem [#allocation4], %s1977_s22 }
  0x46   : > { %1215 = vmatprep.subr.bf16.mxu0 %v1214_v13  ;;  %v1238_v10 = vpack.c.bf16 %v601_v9, %v600_v8  ;;  %v1241_v13 = vpack.c.bf16 %v603_v12, %v602_v11  ;;  %v604_v14 = vld [vmem:[%s2081_s3 + $0x30] sm:$0xff]  ;;  %v605_v15 = vld [vmem:[%s2081_s3 + $0x38] sm:$0xff]  ;;  %v606_v18 = vld [vmem:[%s2081_s3 + $0x40] sm:$0xff]  ;;  %s897_s21 = sshll.u32 %s286_s18, 4  ;;  %s875_s13 = scalar_lea.sflag [#allocation3], %s1977_s22  ;;  %s898_s21 = int_to_ptr.vmem [resolvable:$true] %s897_s21 }
  0x47   : > { %v1244_v17 = vpack.c.bf16 %v605_v15, %v604_v14  ;;  %v609_v23 = vld [vmem:[%s2081_s3 + $0x58] sm:$0xff]  ;;  %v610_v25 = vld [vmem:[%s2081_s3 + $0x60] sm:$0xff]  ;;  %v612_v28 = vld [vmem:[%s2081_s3 + $0x70] sm:$0xff]  ;;  %s1318_s14 = scalar_lea.vmem %s898_s21, 16  ;;  %p1325_p0 = scmp.lt.s32.totalorder %s898_s21, %s1323_s15 }
  0x48   : > { %1153 = vmatpush1.bf16.msra.mxu1 %v1152_v20  ;;  %v607_v20 = vld [vmem:[%s2081_s3 + $0x48] sm:$0xff]  ;;  %v613_v29 = vld [vmem:[%s2081_s3 + $0x78] sm:$0xff]  ;;  %v438_v35 = vld [vmem:[%s2080_s2] sm:$0x3]  ;;  %p1319_p11 = scmp.ne.s32.totalorder %s898_s21, %s1318_s14  ;;  %p1326_p1 = scmp.lt.s32.totalorder %s1324_s17, %s1318_s14 }
  0x49   : > { %1217 = vmatpush1.bf16.msra.mxu0 %v1216_v21  ;;  %1155 = vmatprep.subr.bf16.mxu1 %v1154_v22  ;;  %v1247_v21 = vpack.c.bf16 %v607_v20, %v606_v18  ;;  %v608_v22 = vld [vmem:[%s2081_s3 + $0x50] sm:$0xff]  ;;  %v1256_v30 = vpack.c.bf16 %v613_v29, %v612_v28 }
  0x4a   : > { %1219 = vmatprep.subr.bf16.mxu0 %v1218_v26  ;;  %v1250_v24 = vpack.c.bf16 %v609_v23, %v608_v22  ;;  %v611_v26 = vld [vmem:[%s2081_s3 + $0x68] sm:$0xff]  ;;  %p1320_p12 = pnand %p1319_p11, %p1498_p5  ;;  %p1327_p2 = por %p1326_p1, %p1325_p0 }
  0x4b   : > { %v1253_v27 = vpack.c.bf16 %v611_v26, %v610_v25 }
  0x4c   : > { %1157 = vmatpush1.bf16.msra.mxu1 %v1156_v32  ;;  %v440_v32 = vlaneseq  ;;  %p1321_p13 = pneg %p1320_p12 }
  0x4d   : > { %1221 = vmatpush1.bf16.msra.mxu0 %v1220_v33  ;;  %1159 = vmatprep.subr.bf16.mxu1 %v1158_v34 }
  0x4e   : > { %1223 = vmatprep.subr.bf16.mxu0 %v1222_v38  ;;  %v1969_v33 = vshrl.u32 %v440_v32, 7  ;;  %p1328_p3 = pnand %p1327_p2, %p1321_p13 }
  0x50   : > { %1161 = vmatpush1.bf16.msra.mxu1 %v1160_v44  ;;  %v442_v34 = vsub.s32 0, %v1969_v33  ;;  %v446_v36 = vsub.s32 1, %v1969_v33 }
  0x51   : > { %1225 = vmatpush1.bf16.msra.mxu0 %v1224_v45  ;;  %1163 = vmatprep.subr.bf16.mxu1 %v1162_v46 }
  0x52   : > { %1227 = vmatprep.subr.bf16.mxu0 %v1226_v50  ;;  %v443_v37 = vrot.slane %v438_v35, %v442_v34  ;;  %v447_v38 = vrot.slane %v438_v35, %v446_v36 }
  0x54   : > { %1165 = vmatpush1.bf16.msra.mxu1 %v1164_v56 }
  0x55   : > { %1229 = vmatpush1.bf16.msra.mxu0 %v1228_v57  ;;  %1167 = vmatprep.subr.bf16.mxu1 %v1166_v58 }
  0x56   : > { %1231 = vmatprep.subr.bf16.mxu0 %v1230_v61 }
  0x58   : > { %1169 = vmatpush1.bf16.msra.mxu1 %v1168_v0 }
  0x59   : > { %1233 = vmatpush1.bf16.msra.mxu0 %v1232_v1  ;;  %1234 = vmatprep.subr.bf16.mxu1 %v1414_v7 }
  0x5b   : > { %515 = vmatmul.mubr.f32.vlgmr.msra.gmra.mrb[0].mxu1 %v1919_v4 }
  0x5c   : > { %586 = vmatmul.mubr.f32.vlgmr.msra.gmra.mrb[0].mxu0 %v1922_v6  ;;  %1236 = vmatpush3.bf16.msra.mxu1 %v1235_v5 }
  0x5d   : > { %1237 = vmatprep.subr.bf16.mxu1 %v1414_v7  ;;  %1103 = vmatprep.mubr.msk.f32.mxu1 %vm1415_vm0, %v1416_v31 }
  0x60   : > { %1239 = vmatpush3.bf16.msra.mxu1 %v1238_v10 }
  0x61   : > { %1240 = vmatprep.subr.bf16.mxu1 %v1414_v7 }
  0x64   : > { %1242 = vmatpush3.bf16.msra.mxu1 %v1241_v13 }
  0x65   : > { %1243 = vmatprep.subr.bf16.mxu1 %v1414_v7 }
  0x68   : > { %1245 = vmatpush3.bf16.msra.mxu1 %v1244_v17 }
  0x69   : > { %1246 = vmatprep.subr.bf16.mxu1 %v1414_v7 }
  0x6c   : > { %1248 = vmatpush3.bf16.msra.mxu1 %v1247_v21 }
  0x6d   : > { %1249 = vmatprep.subr.bf16.mxu1 %v1414_v7 }
  0x70   : > { %1251 = vmatpush3.bf16.msra.mxu1 %v1250_v24 }
  0x71   : > { %1252 = vmatprep.subr.bf16.mxu1 %v1414_v7 }
  0x74   : > { %1254 = vmatpush3.bf16.msra.mxu1 %v1253_v27 }
  0x75   : > { %1255 = vmatprep.subr.bf16.mxu1 %v1414_v7 }
  0x78   : > { %1257 = vmatpush3.bf16.msra.mxu1 %v1256_v30 }
 0x12e   : > { %v516_v39 = vpop.f32.mrb[0].mxu1 }
 0x12f   : > { %v517_v40 = vadd.f32 %v516_v39, %v443_v37  ;;  %v518_v41 = vpop.f32.mrb[1].mxu1  ;;  %v587_v42 = vpop.f32.mrb[0].mxu0 }
 0x130   : > { %v519_v43 = vadd.f32 %v518_v41, %v447_v38  ;;  %v589_v44 = vpop.f32.mrb[1].mxu0 }
 0x131   : > { %v588_v45 = vadd.f32 %v587_v42, %v517_v40 }
 0x132   : > { %v590_v46 = vadd.f32 %v589_v44, %v519_v43 }
 0x134   : > { %v593_v47 = vmul.f32 0.5, %v590_v46 }
 0x136   : > { %1310 = vtanh.f32 %v593_v47 }
 0x137   : > { %1312 = vtanh.f32 %v588_v45 }
 0x140   : > { %v1311_v48 = vpop.eup %1310 }
 0x141   : > { %v595_v49 = vadd.f32 1.0, %v1311_v48  ;;  %v1313_v51 = vpop.eup %1312 }
 0x143   : > { %v596_v50 = vmul.f32 0.5, %v595_v49 }
 0x145   : > { %v597_v52 = vmul.f32 %v1313_v51, %v596_v50 }
 0x147   : > { %1104 = vmatmul.mubr.f32.vlgmr.msra.gmra.mrb[2].mxu1 %v597_v52 }
 0x21a   : > { %v680_v53 = vpop.f32.mrb[2].mxu1 }
 0x21b   : > { %684 = vxpose.xlu0.b32.start.end [1/1] (short) (narrow) %v680_v53, 8  ;;  %v1105_v54 = vpop.f32.mrb[3].mxu1 }
 0x29b   : > { %v700_v55 = vpop.trf.xlu0 }
 0x29c   : > { %v717_v56 = vsel %vm716_vm1, %v700_v55, -inf }
 0x29d   : > { %718 = vmax.xlane.f32.xlu0 %v717_v56 }
 0x32a   : > { %v719_v57 = vpop.xlane.xlu0 %718 }
 0x32b   : > { %v720_v58 = vsub.f32 %v700_v55, %v719_v57 }
 0x32d   : > { %v721_v59 = vmul.f32 1.442695, %v720_v58 }
 0x32f   : > { %1314 = vpow2.f32 %v721_v59 }
 0x339   : > { %v1315_v60 = vpop.eup %1314 }
 0x33a   : > { %v723_v61 = vsel %vm716_vm1, %v1315_v60, 0.0 }
 0x33b   : > { %724 = vadd.xlane.f32.xlu1 %v723_v61 }
 0x3c8   : > { %v725_v62 = vpop.xlane.xlu1 %724 }
 0x3c9   : > { %1316 = vrcp.f32 %v725_v62 }
 0x3d3   : > { %v1317_v63 = vpop.eup %1316 }
 0x3d4   : > { %v727_v0 = vmul.f32 %v1317_v63, %v1315_v60 }
 0x3d6   : > { %v735_v1 = vrot.slane %v727_v0, %v442_v34  ;;  %729 = vst.msk [vmem:[%s286_s18] sm:$0x1] %vm728_vm2, %v727_v0  ;;  %v804_v2 = vrot.slane %v727_v0, %v446_v36 }
 0x3d7   : > { %731 = vst.msk [vmem:[%s2086_s19 - $0x1] sm:$0x2] %vm730_vm3, %v727_v0 }
 0x3d8   : > { %737 = vbcast.lane.b32.xlu1 %v735_v1, 256 }
 0x3dc   : > { %806 = vbcast.lane.b32.xlu1 %v804_v2, 256 }
 0x3dd   : > { %1331 = shalt.err (!%p1328_p3)
}
 0x3de   : > { %s1332_s18 = scalar_lea.hbm %s1989_s9, 16  ;;  %s1336_s16 = scalar_lea.hbm %s2084_s6, 32 }
 0x3df   : > { %p1333_p4 = scmp.ne.s32.totalorder %s1989_s9, %s1332_s18  ;;  %p1337_p9 = scmp.lt.u32.totalorder %s1989_s9, %s2084_s6 }
 0x3e0   : > { %p1338_p10 = scmp.lt.u32.totalorder %s1336_s16, %s1332_s18  ;;  %p1340_p12 = scmp.lt.u32.totalorder %s1332_s18, %s1989_s9 }
 0x3e1   : > { %p1334_p7 = pnand %p1333_p4, %p1498_p5 }
 0x3e2   : > { %p1339_p11 = por %p1338_p10, %p1337_p9 }
 0x3e3   : > { %p1335_p8 = pneg %p1334_p7 }
 0x3e4   : > { %p1341_p13 = por %p1340_p12, %p1339_p11 }
 0x3e6   : > { %p1342_p0 = pnand %p1341_p13, %p1335_p8 }
 0x3e8   : > { %1345 = shalt.err (!%p1342_p0)
}
 0x3e9   : > { %1262 = dma.vmem_to_hbm [thread:$0]  (%p1498_p5), %s898_s21, 16, %s1989_s9, %s875_s13  }
 0x3ea   : > { %s2014_s19 = scalar_lea.hbm %s2085_s7, %s1049_s20  ;;  %s2093_s23 = scalar_lea.vmem [#allocation4], %s1977_s22 }
 0x3eb   : > { %s910_s29 = sshll.u32 %s2093_s23, 4  ;;  %s879_s18 = scalar_lea.sflag [#allocation5], %s1977_s22  ;;  %s911_s29 = int_to_ptr.vmem [resolvable:$true] %s910_s29 }
 0x3ec   : > { %s1346_s16 = scalar_lea.vmem %s911_s29, 16  ;;  %s1418_s15 = smov [#allocation4]  }
 0x3ed   : > { %p1347_p1 = scmp.ne.s32.totalorder %s911_s29, %s1346_s16  ;;  %s1350_s0 = sshll.u32 %s1418_s15, 4  ;;  %s1351_s0 = int_to_ptr.vmem [resolvable:$false] %s1350_s0 }
 0x3ee   : > { %s1352_s1 = scalar_lea.vmem %s1351_s0, 32  ;;  %p1353_p4 = scmp.lt.s32.totalorder %s911_s29, %s1351_s0 }
 0x3ef   : > { %p1348_p2 = pnand %p1347_p1, %p1498_p5  ;;  %p1354_p7 = scmp.lt.s32.totalorder %s1352_s1, %s1346_s16 }
 0x3f1   : > { %p1349_p3 = pneg %p1348_p2  ;;  %p1355_p8 = por %p1354_p7, %p1353_p4 }
 0x3f3   : > { %p1356_p9 = pnand %p1355_p8, %p1349_p3 }
 0x3f5   : > { %1359 = shalt.err (!%p1356_p9)
}
 0x3f6   : > { %s1360_s28 = scalar_lea.hbm %s2014_s19, 16  ;;  %s1364_s21 = scalar_lea.hbm %s2085_s7, 32 }
 0x3f7   : > { %p1361_p10 = scmp.ne.s32.totalorder %s2014_s19, %s1360_s28  ;;  %p1365_p13 = scmp.lt.u32.totalorder %s2014_s19, %s2085_s7 }
 0x3f8   : > { %p1366_p0 = scmp.lt.u32.totalorder %s1364_s21, %s1360_s28  ;;  %p1368_p2 = scmp.lt.u32.totalorder %s1360_s28, %s2014_s19 }
 0x3f9   : > { %p1362_p11 = pnand %p1361_p10, %p1498_p5 }
 0x3fa   : > { %p1367_p1 = por %p1366_p0, %p1365_p13 }
 0x3fb   : > { %p1363_p12 = pneg %p1362_p11 }
 0x3fc   : > { %p1369_p3 = por %p1368_p2, %p1367_p1 }
 0x3fe   : > { %p1370_p4 = pnand %p1369_p3, %p1363_p12 }
 0x400   : > { %1373 = shalt.err (!%p1370_p4)
}
 0x401   : > { %1263 = dma.vmem_to_hbm [thread:$0]  (%p1498_p5), %s911_s29, 16, %s2014_s19, %s879_s18   ;;  %v1419_v3 = vmov 1966171168   ;;  %vm798_vm4 = vcmp.lt.s32.totalorder %v440_v32, 512 }
 0x402   : > { %v774_v5 = vunpack.c.l.s4 %v1419_v3  ;;  %s1047_s1 = sshll.u32 %s1740_s8, 2 }
 0x403   : > { %s301_s14 = scalar_lea.vmem %s2082_s4, %s1047_s1  ;;  %s305_s19 = scalar_lea.vmem %s2083_s5, %s1047_s1 }
 0x404   : > { %v775_v7 = vunpack.c.0.s8 %v774_v5 }
 0x406   : > { %v2041_v18 = vsub.s32 %v775_v7, %v1969_v33 }
 0x44a   : > { %v738_v8 = vpop.permute.xlu1 %737 }
 0x44b   : > { %v739_v9 = vmul.f32 %v738_v8, %v1919_v4  ;;  %v740_v10 = vmul.f32 %v738_v8, %v1815_v16  ;;  %v741_v11 = vmul.f32 %v738_v8, %v1922_v6  ;;  %v742_v12 = vmul.f32 %v738_v8, %v1825_v19 }
 0x44d   : > { %v743_v13 = vrot.slane %v739_v9, 4  ;;  %v749_v14 = vrot.slane %v740_v10, 4  ;;  %v755_v15 = vrot.slane %v741_v11, 4  ;;  %v761_v17 = vrot.slane %v742_v12, 4 }
 0x44e   : > { %v807_v20 = vpop.permute.xlu1 %806 }
 0x44f   : > { %v744_v21 = vadd.f32 %v743_v13, %v739_v9  ;;  %v750_v22 = vadd.f32 %v749_v14, %v740_v10  ;;  %v756_v23 = vadd.f32 %v755_v15, %v741_v11  ;;  %v762_v24 = vadd.f32 %v761_v17, %v742_v12 }
 0x450   : > { %v808_v25 = vmul.f32 %v807_v20, %v1919_v4  ;;  %v809_v26 = vmul.f32 %v807_v20, %v1815_v16  ;;  %v810_v27 = vmul.f32 %v807_v20, %v1922_v6  ;;  %v811_v28 = vmul.f32 %v807_v20, %v1825_v19 }
 0x451   : > { %v745_v29 = vrot.slane %v744_v21, 2  ;;  %v751_v30 = vrot.slane %v750_v22, 2  ;;  %v757_v31 = vrot.slane %v756_v23, 2  ;;  %v763_v34 = vrot.slane %v762_v24, 2 }
 0x452   : > { %v812_v35 = vrot.slane %v808_v25, 4  ;;  %v818_v33 = vrot.slane %v809_v26, 4  ;;  %v824_v36 = vrot.slane %v810_v27, 4  ;;  %v830_v37 = vrot.slane %v811_v28, 4 }
 0x453   : > { %v746_v38 = vadd.f32 %v745_v29, %v744_v21  ;;  %v752_v39 = vadd.f32 %v751_v30, %v750_v22  ;;  %v758_v40 = vadd.f32 %v757_v31, %v756_v23  ;;  %v764_v41 = vadd.f32 %v763_v34, %v762_v24 }
 0x454   : > { %v813_v42 = vadd.f32 %v812_v35, %v808_v25  ;;  %v819_v4 = vadd.f32 %v818_v33, %v809_v26  ;;  %v825_v43 = vadd.f32 %v824_v36, %v810_v27  ;;  %v831_v16 = vadd.f32 %v830_v37, %v811_v28 }
 0x455   : > { %v747_v44 = vrot.slane %v746_v38, 1  ;;  %v753_v6 = vrot.slane %v752_v39, 1  ;;  %v759_v45 = vrot.slane %v758_v40, 1  ;;  %v765_v19 = vrot.slane %v764_v41, 1 }
 0x456   : > { %v814_v46 = vrot.slane %v813_v42, 2  ;;  %v820_v47 = vrot.slane %v819_v4, 2  ;;  %v826_v48 = vrot.slane %v825_v43, 2  ;;  %v832_v49 = vrot.slane %v831_v16, 2 }
 0x457   : > { %v748_v50 = vadd.f32 %v747_v44, %v746_v38  ;;  %v754_v51 = vadd.f32 %v753_v6, %v752_v39  ;;  %v760_v52 = vadd.f32 %v759_v45, %v758_v40  ;;  %v766_v53 = vadd.f32 %v765_v19, %v764_v41 }
 0x458   : > { %v815_v54 = vadd.f32 %v814_v46, %v813_v42  ;;  %v821_v55 = vadd.f32 %v820_v47, %v819_v4  ;;  %v827_v56 = vadd.f32 %v826_v48, %v825_v43  ;;  %v833_v57 = vadd.f32 %v832_v49, %v831_v16 }
 0x459   : > { %v771_v58 = vcombine.low %v748_v50, %v754_v51  ;;  %v772_v59 = vcombine.low %v760_v52, %v766_v53 }
 0x45a   : > { %v816_v60 = vrot.slane %v815_v54, 1  ;;  %v822_v61 = vrot.slane %v821_v55, 1  ;;  %v828_v62 = vrot.slane %v827_v56, 1  ;;  %v834_v63 = vrot.slane %v833_v57, 1 }
 0x45b   : > { %v779_v0 = vrot.slane %v771_v58, %v2041_v18  ;;  %v786_v1 = vrot.slane %v772_v59, %v2041_v18 }
 0x45c   : > { %v817_v2 = vadd.f32 %v816_v60, %v815_v54  ;;  %v823_v3 = vadd.f32 %v822_v61, %v821_v55  ;;  %v829_v5 = vadd.f32 %v828_v62, %v827_v56  ;;  %v835_v7 = vadd.f32 %v834_v63, %v833_v57 }
 0x45d   : > { %v787_v8 = vcombine.low %v779_v0, %v786_v1 }
 0x45e   : > { %v840_v9 = vcombine.low %v817_v2, %v823_v3  ;;  %v841_v10 = vcombine.low %v829_v5, %v835_v7 }
 0x45f   : > { %v794_v11 = vrot.slane %v787_v8, %v2041_v18 }
 0x460   : > { %v848_v12 = vrot.slane %v840_v9, %v2041_v18  ;;  %v855_v13 = vrot.slane %v841_v10, %v2041_v18 }
 0x461   : > { %800 = vst.msk [vmem:[%s301_s14] sm:$0xf] %vm798_vm4, %v794_v11 }
 0x462   : > { %v856_v14 = vcombine.low %v848_v12, %v855_v13 }
 0x464   : > { %v863_v15 = vrot.slane %v856_v14, %v2041_v18 }
 0x466   : > { %865 = vst.msk [vmem:[%s305_s19] sm:$0xf] %vm798_vm4, %v863_v15 }
 0x467 PF: > { %p1273_p5 = scmp.ge.s32.totalorder %s1412_s27, 2  ;;  %s936_s23 = sand.u32 1, %s1400_s24  }
 0x468   : > { %s937_s29 = scalar_lea.sflag [#allocation3], %s936_s23 }
 0x469   : > { %p1267_p7 = pnand %p1273_p5, %p1502_p6 }
 0x46b   : > { %1391 = dma.done.wait (!%p1267_p7), %s937_s29, 16  }
 0x46c   : > { %1393 = vsyncadd (!%p1267_p7), %s937_s29, 4294967280  ;;  %s945_s18 = scalar_lea.sflag [#allocation5], %s936_s23 }
 0x46d   : > { %1395 = dma.done.wait (!%p1267_p7), %s945_s18, 16  }
 0x46e   : > { %1397 = vsyncadd (!%p1267_p7), %s945_s18, 4294967280  ;;  %p21_p8 = scmp.ge.s32.totalorder %s1485_s30, 4   ;;  %s2094_s24 = smov %s1404_s25 }
 0x46f   : > { %s2095_s25 = smov %s1408_s26  ;;  %s2096_s26 = smov %s1496_s10 }
 0x470   : > { %s2097_s27 = smov %s1485_s30  ;;  %23 = sbr.rel (!%p21_p8) target bundleno = 8 (0x8), region = 112 }
 0x477   :  { %949 = vsyncpa [#allocation3], 1 }
 0x478   :  { %951 = vsyncpa [#allocation3 + $0x1], 1 }
 0x479   :  { %952 = vsyncpa [#allocation5], 1 }
 0x47a   :  { %954 = vsyncpa [#allocation5 + $0x1], 1 }

</bundles_post_ra>
